<compile_context>
chip_gen: v6e
topology: v6e:2x2x1
jax: 0.10.0
libtpu: 0.0.40
codegen_flags: <defaults>
</compile_context>

<pallas_src>
import functools

import jax
import jax.numpy as jnp
from jax.experimental import pallas as pl
from jax.experimental.pallas import tpu as pltpu


def autopad(k, p=None):
    if p is None:
        p = k // 2 if isinstance(k, int) else [x // 2 for x in k]
    return p


# ------------------------- Pallas kernel (hot path) --------------------------

def _make_conv_bn_act_kernel(use_relu):
    def kernel(w_ref, b_ref, x_ref, o_ref):
        # w_ref: (C2, K)  bf16, BN scale folded in (grid-invariant, resident)
        # b_ref: (C2, 1)  f32 folded BN bias       (grid-invariant, resident)
        # x_ref: (K, tn)  input patch columns in their stored dtype
        # o_ref: (C2, tn) bf16 -> lane-dense spatial output (native NCHW layout)
        xb = x_ref[...].astype(jnp.bfloat16)   # cheap VPU cast hidden under MXU/DMA
        y = jnp.dot(w_ref[...], xb, preferred_element_type=jnp.float32)
        y = y + b_ref[...]
        if use_relu:
            y = jnp.maximum(y, 0.0)
        o_ref[...] = y.astype(o_ref.dtype)
    return kernel


# ------------------------------ sizing helpers --------------------------------

def _round_up(v, m):
    return ((v + m - 1) // m) * m


def _vmem_capacity_bytes():
    try:
        info = pltpu.get_tpu_info()
        cap = getattr(info, "vmem_capacity_bytes", None)
        if cap:
            return int(cap)
    except Exception:
        pass
    return 64 << 20  # conservative fallback = v7x per-TC VMEM


def _vmem_estimate_bytes(K, C2, tn, x_itemsize):
    """Footprint incl. sublane/lane layout padding and double-buffering."""
    x_sub = max(8, 32 // max(1, x_itemsize))
    x_tile = 2 * _round_up(K, x_sub) * _round_up(tn, 128) * x_itemsize   # dbl-buf
    o_tile = 2 * _round_up(C2, 16) * _round_up(tn, 128) * 2              # bf16 out
    # TODO(synk): single-buffer the grid-invariant weight/bias via
    # pipeline_mode=pl.Buffered(1) once verified on the target jax version;
    # until then account for the default double-buffering here.
    w_res = 2 * _round_up(C2, 16) * _round_up(K, 128) * 2                # bf16 W
    b_res = 2 * _round_up(C2, 8) * 128 * 4                               # f32 bias
    return x_tile + o_tile + w_res + b_res


def _pick_spatial_tile(S, K, C2, x_itemsize, budget, max_tn=2048):
    """Largest lane-dense tile (multiple of 128) within the VMEM budget."""
    tn = max(128, (min(max_tn, _round_up(S, 128)) // 128) * 128)
    while tn > 128 and _vmem_estimate_bytes(K, C2, tn, x_itemsize) > budget:
        tn -= 128
    # TODO(synk): if even tn=128 exceeds the budget (very large C2*K), add an
    # innermost "arbitrary" K-reduction grid axis with a (C2, tn) f32
    # accumulator (or tile C2) instead of relying on a raised vmem limit.
    return tn


# ------------------------- pallas_call wrapper ---------------------------------

def _conv_bn_act(patches, w2, bias2, use_relu):
    # patches: (N, K, S) in x's stored dtype ; w2: (C2, K) bf16 ; bias2: (C2, 1) f32
    N, K, S = patches.shape
    C2 = w2.shape[0]
    x_itemsize = jnp.dtype(patches.dtype).itemsize

    cap = _vmem_capacity_bytes()
    vmem_limit = min(int(cap * 0.70), 96 << 20)      # leave Mosaic scratch headroom
    budget = int(vmem_limit * 0.85)
    tn = _pick_spatial_tile(S, K, C2, x_itemsize, budget)
    est = _vmem_estimate_bytes(K, C2, tn, x_itemsize)
    vmem_limit = max(vmem_limit, min(int(cap * 0.90), est + (8 << 20)))

    num_sp = pl.cdiv(S, tn)

    # Put the larger parallel axis first so the 2-TC split on v7x always has a
    # non-trivial leading axis (e.g. batch-1 inference shards on spatial tiles).
    if num_sp >= N:
        grid = (num_sp, N)
        xmap = lambda j, n: (n, 0, j)
        cmap = lambda j, n: (0, 0)
    else:
        grid = (N, num_sp)
        xmap = lambda n, j: (n, 0, j)
        cmap = lambda n, j: (0, 0)

    return pl.pallas_call(
        _make_conv_bn_act_kernel(use_relu),
        out_shape=jax.ShapeDtypeStruct((N, C2, S), jnp.bfloat16),
        grid_spec=pltpu.PrefetchScalarGridSpec(
            num_scalar_prefetch=0,
            grid=grid,
            in_specs=[
                pl.BlockSpec((C2, K), cmap),            # folded weight (resident)
                pl.BlockSpec((C2, 1), cmap),            # folded bias   (resident)
                pl.BlockSpec((None, K, tn), xmap),      # input columns
            ],
            out_specs=pl.BlockSpec((None, C2, tn), xmap),
        ),
        compiler_params=pltpu.CompilerParams(
            dimension_semantics=("parallel", "parallel"),
            vmem_limit_bytes=int(vmem_limit),
        ),
    )(w2, bias2, patches)


# ------------------------------ JAX glue --------------------------------------

def _extract_patches(x_nchw, k, s, p):
    """(N, C1, H, W) -> (N, C1*k*k, Ho*Wo), feature order (c, kh, kw)."""
    N, C1, H, W = x_nchw.shape
    Ho = (H + 2 * p - k) // s + 1
    Wo = (W + 2 * p - k) // s + 1
    if k == 1 and s == 1 and p == 0:
        # Pointwise conv: zero-copy reshape, input stays in NCHW layout & dtype.
        return x_nchw.reshape(N, C1, H * W), Ho, Wo
    # TODO(synk): replace this host-side im2col (k*k-fold HBM blowup) with an
    # in-kernel K-reduction grid axis over (kh, kw)-shifted windows of the
    # padded input (pl.when-guarded f32 accumulator), so HBM is read once.
    xp = jnp.pad(x_nchw, ((0, 0), (0, 0), (p, p), (p, p)))
    cols = []
    for kh in range(k):
        for kw in range(k):
            cols.append(xp[:, :, kh:kh + (Ho - 1) * s + 1:s,
                           kw:kw + (Wo - 1) * s + 1:s])
    pat = jnp.stack(cols, axis=2)                      # (N, C1, k*k, Ho, Wo)
    return pat.reshape(N, C1 * k * k, Ho * Wo), Ho, Wo


class ConvPallas:
    """Mirror of the PyTorch Conv module (groups=1, bias=False, act=ReLU)."""

    def __init__(self, c1, c2, k=1, s=1, p=None, g=1, act=True, *, key):
        assert g == 1, "groups != 1 not supported"  # TODO(synk): grouped conv
        self.c1, self.c2, self.k, self.s = c1, c2, k, s
        self.p = autopad(k, p)
        self.use_relu = act is True  # TODO(synk): arbitrary act modules -> identity
        self.eps = 1e-5
        k0, k1, k2, k3, k4 = jax.random.split(key, 5)
        fan_in = c1 * k * k
        self.weight = (jax.random.normal(k0, (c2, c1, k, k), jnp.float32)
                       * (2.0 / fan_in) ** 0.5)
        # BatchNorm2d parameters + running stats (eval mode).
        self.gamma = 1.0 + 0.1 * jax.random.normal(k1, (c2,), jnp.float32)
        self.beta = 0.1 * jax.random.normal(k2, (c2,), jnp.float32)
        self.running_mean = 0.1 * jax.random.normal(k3, (c2,), jnp.float32)
        self.running_var = jnp.abs(
            1.0 + 0.1 * jax.random.normal(k4, (c2,), jnp.float32))

    @functools.partial(jax.jit, static_argnums=0)
    def __call__(self, x_nchw):
        N = x_nchw.shape[0]
        patches, Ho, Wo = _extract_patches(x_nchw, self.k, self.s, self.p)

        # Fold BN (eval mode) into the weight / bias once; tiny one-time work.
        scale = self.gamma / jnp.sqrt(self.running_var + self.eps)       # (C2,)
        w2 = (self.weight.reshape(self.c2, -1)
              * scale[:, None]).astype(jnp.bfloat16)                     # (C2, K)
        bias2 = (self.beta - self.running_mean * scale).reshape(self.c2, 1)

        y = _conv_bn_act(patches, w2, bias2, self.use_relu)   # (N, C2, S) bf16
        return y.reshape(N, self.c2, Ho, Wo)                  # zero-copy, NCHW


# -------------------------------- demo ----------------------------------------

if __name__ == "__main__":
    key = jax.random.PRNGKey(0)
    kx, kp = jax.random.split(key)

    # Module defaults: k=1, s=1 (pointwise conv), act=ReLU.
    c1, c2 = 4, 8
    module = ConvPallas(c1, c2, k=1, s=1, key=kp)

    x = jax.random.normal(kx, (2, c1, 16, 16), jnp.float32)    # NCHW
    out = jax.block_until_ready(module(x))
    assert out.shape == (2, c2, 16, 16)
    assert out.dtype == jnp.bfloat16
    out32 = out.astype(jnp.float32)

    # Reference 1: mirrors kernel numerics (bf16 operands, f32 accumulation,
    # bf16 output rounding covered by the tolerance).
    scale = module.gamma / jnp.sqrt(module.running_var + module.eps)
    bias = module.beta - module.running_mean * scale
    w_bf = (module.weight.reshape(c2, c1) * scale[:, None]).astype(jnp.bfloat16)
    ref = jnp.einsum('nchw,oc->nohw',
                     x.astype(jnp.bfloat16).astype(jnp.float32),
                     w_bf.astype(jnp.float32))
    ref = jnp.maximum(ref + bias[None, :, None, None], 0.0)
    assert jnp.allclose(out32, ref, atol=3e-2, rtol=3e-2), \
        float(jnp.max(jnp.abs(out32 - ref)))

    # Reference 2: full-precision forward (loose tolerance for bf16 path).
    ref32 = jnp.einsum('nchw,oc->nohw', x, module.weight.reshape(c2, c1))
    ref32 = jnp.maximum(ref32 * scale[None, :, None, None]
                        + bias[None, :, None, None], 0.0)
    assert jnp.allclose(out32, ref32, atol=1.5e-1, rtol=1.5e-1)

    print("KERNEL_OK")
</pallas_src>

<mosaic_0001>
module attributes {stable_mosaic.version = 11 : i64} {
  func.func @kernel(%arg0: i32, %arg1: i32, %arg2: memref<8x4xbf16, #tpu.memory_space<vmem>>, %arg3: memref<8x1xf32, #tpu.memory_space<vmem>>, %arg4: memref<1x4x256xf32, #tpu.memory_space<vmem>>, %arg5: memref<1x8x256xbf16, #tpu.memory_space<vmem>>) attributes {dimension_semantics = [#tpu.dimension_semantics<parallel>, #tpu.dimension_semantics<parallel>], iteration_bounds = array<i64: 2, 1>, scalar_prefetch = 0 : i64, scratch_operands = 0 : i64, tpu.core_type = #tpu.core_type<tc>, window_params = [{pipeline_mode = #tpu.pipeline_mode<synchronous>, transform_indices = @transform_0, window_bounds = array<i64: 8, 4>}, {pipeline_mode = #tpu.pipeline_mode<synchronous>, transform_indices = @transform_1, window_bounds = array<i64: 8, 1>}, {transform_indices = @transform_2, window_bounds = array<i64: 1, 4, 256>}, {transform_indices = @transform_3, window_bounds = array<i64: 1, 8, 256>}]} {
    %c0 = arith.constant 0 : index
    %c0_0 = arith.constant 0 : index
    %c0_1 = arith.constant 0 : index
    %0 = vector.load %arg4[%c0, %c0_0, %c0_1] : memref<1x4x256xf32, #tpu.memory_space<vmem>>, vector<1x4x256xf32>
    %1 = vector.shape_cast %0 : vector<1x4x256xf32> to vector<4x256xf32>
    %2 = arith.truncf %1 : vector<4x256xf32> to vector<4x256xbf16>
    %c0_2 = arith.constant 0 : index
    %c0_3 = arith.constant 0 : index
    %3 = vector.load %arg2[%c0_2, %c0_3] : memref<8x4xbf16, #tpu.memory_space<vmem>>, vector<8x4xbf16>
    %cst = arith.constant dense<0.000000e+00> : vector<8x256xf32>
    %4 = tpu.matmul %3, %2, %cst {dimension_numbers = #tpu.dot_dimension_numbers<[1], [0], [0], [1], [0, 0, 1, 1], [], []>} : vector<8x4xbf16>, vector<4x256xbf16>, vector<8x256xf32> -> vector<8x256xf32>
    %c0_4 = arith.constant 0 : index
    %c0_5 = arith.constant 0 : index
    %5 = vector.load %arg3[%c0_4, %c0_5] : memref<8x1xf32, #tpu.memory_space<vmem>>, vector<8x1xf32>
    %6 = vector.broadcast %5 : vector<8x1xf32> to vector<8x256xf32>
    %7 = arith.addf %4, %6 : vector<8x256xf32>
    %cst_6 = arith.constant 0.000000e+00 : f32
    %8 = vector.broadcast %cst_6 : f32 to vector<8x256xf32>
    %9 = arith.maximumf %7, %8 : vector<8x256xf32>
    %10 = arith.truncf %9 : vector<8x256xf32> to vector<8x256xbf16>
    %c0_7 = arith.constant 0 : index
    %c0_8 = arith.constant 0 : index
    %c0_9 = arith.constant 0 : index
    %11 = vector.load %arg5[%c0_7, %c0_8, %c0_9] : memref<1x8x256xbf16, #tpu.memory_space<vmem>>, vector<1x8x256xbf16>
    %12 = vector.shape_cast %11 : vector<1x8x256xbf16> to vector<8x256xbf16>
    %13 = vector.shape_cast %10 : vector<8x256xbf16> to vector<1x8x256xbf16>
    tpu.vector_store %arg5[%c0_7, %c0_8, %c0_9], %13 {strides = array<i32>} : memref<1x8x256xbf16, #tpu.memory_space<vmem>>, vector<1x8x256xbf16>,
    return
  }
  func.func @transform_0(%arg0: i32, %arg1: i32) -> (i32, i32) {
    %c0_i32 = arith.constant 0 : i32
    %c0_i32_0 = arith.constant 0 : i32
    %c0_i32_1 = arith.constant 0 : i32
    return %c0_i32, %c0_i32_0 : i32, i32
  }
  func.func @transform_1(%arg0: i32, %arg1: i32) -> (i32, i32) {
    %c0_i32 = arith.constant 0 : i32
    %c0_i32_0 = arith.constant 0 : i32
    %c0_i32_1 = arith.constant 0 : i32
    return %c0_i32, %c0_i32_0 : i32, i32
  }
  func.func @transform_2(%arg0: i32, %arg1: i32) -> (i32, i32, i32) {
    %c0_i32 = arith.constant 0 : i32
    %c0_i32_0 = arith.constant 0 : i32
    return %arg0, %c0_i32, %arg1 : i32, i32, i32
  }
  func.func @transform_3(%arg0: i32, %arg1: i32) -> (i32, i32, i32) {
    %c0_i32 = arith.constant 0 : i32
    %c0_i32_0 = arith.constant 0 : i32
    return %arg0, %c0_i32, %arg1 : i32, i32, i32
  }
}

</mosaic_0001>

<bundles_post_ra>
// kernel: a_call__.1
= control target key start
LH: loop header
LB: loop body
LE: loop exit
PB: predicated region body
PF: predicated region fallthrough
CT: control target
= control target key end

     0   :  { %s463_s12 = smov 0   ;;  %s465_s13 = smov 0   ;;  %s502_s0 = inlined_call_operand.vmem [shape: bf16[8,4], index: 0, kind: input, shape index: {}]   ;;  %s503_s1 = inlined_call_operand.vmem [shape: f32[8,1], index: 1, kind: input, shape index: {}]   ;;  %s504_s2 = inlined_call_operand.vmem [shape: f32[2,4,256], index: 2, kind: input, shape index: {}]   ;;  %s505_s3 = inlined_call_operand.vmem [shape: bf16[2,8,256], index: 3, kind: output, shape index: {}]  }
   0x1   :  { %s467_s14 = smov 0  }
   0x2 LB: > { %s25_s15 = sadd.s32 1, %s436_s13  ;;  %p378_p0 = scmp.ge.s32.totalorder %s440_s14, 1  ;;  %s440_s14 = sphi %s467_s14, %s13_s14   ;;  %s436_s13 = sphi %s465_s13, %s507_s13   ;;  %s432_s12 = sphi %s463_s12, %s506_s12  }
   0x3   : > { %p27_p1 = scmp.ge.s32.totalorder %s25_s15, 2  ;;  %p158_p2 = scmp.lt.s32.totalorder %s440_s14, 3 }
   0x5   : > { %s509_s15 = smov (%p27_p1, %s25_s15), 0  ;;  %p159_p3 = pnand %p378_p0, %p158_p2 }
   0x6   : > { %p191_p4 = scmp.lt.s32.totalorder (!%p159_p3), %s432_s12, 1 }
   0x7   : > { %162 = sbr.rel (%p159_p3) target bundleno = 226 (0xe2), region = 32 }
   0xc   : > { %v442_v0 = vmov 0   ;;  %v218_v1 = vld [vmem:[%s503_s1] sm:$0xff]  ;;  %s511_s12 = smov (!%p191_p4, %s432_s12), 1  ;;  %vm228_vm0 = vcmask 1041408   ;;  %vm224_vm1 = vcmask 31744  }
   0xd   : > { %267 = vmatprep.mubr.bf16.mxu0 %v442_v0  ;;  %416 = vset.pattern.permute.xlu0 %v442_v0  ;;  %s388_s18 = sshll.u32 %s511_s12, 3  ;;  %v217_v7 = vld [vmem:[%s502_s0] sm:$0xf] }
   0xe   : > { %221 = vperm.xlu0 %416, %v218_v1   ;;  %s198_s21 = scalar_lea.vmem %s504_s2, %s388_s18  ;;  %s208_s26 = scalar_lea.vmem %s505_s3, %s388_s18 }
   0xf   : > { %v211_v2 = vld [vmem:[%s198_s21] sm:$0xff] }
  0x10   : > { %v213_v3 = vcombine.high %v211_v2, %v211_v2  ;;  %v215_v4 = vpack.c.bf16 %v211_v2, %v211_v2 }
  0x12   : > { %v216_v5 = vpack.c.bf16 %v213_v3, %v213_v3  ;;  %v230_v6 = vsel %vm228_vm0, %v215_v4, 0 }
  0x14   : > { %383 = vmatprep.subr.msk.bf16.mxu0 %vm228_vm0, %v216_v5 }
  0x15   : > { %250 = vmatpush1.bf16.msra.mxu0 %v230_v6 }
  0x18   : > { %384 = vmatmul.mubr.msk.bf16.vlgmr.msra.gmra.mxu0 %vm224_vm1, %v217_v7 }
  0x89   : > { %v222_v8 = vpop.permute.xlu0 %221 }
  0xd8   : > { %v269_v9 = vpop.f32.mrf.mxu0 }
  0xd9   : > { %v270_v10 = vadd.f32 %v269_v9, %v222_v8 }
  0xda   : > { %v271_v11 = vpop.f32.mrf.mxu0 }
  0xdb   : > { %v272_v12 = vadd.f32 %v271_v11, %v222_v8  ;;  %v276_v14 = vmax.f32 %v270_v10, 0.0 }
  0xdc   : > { %v273_v13 = vpop.f32.mrf.mxu0 }
  0xdd   : > { %v277_v15 = vmax.f32 %v272_v12, 0.0 }
  0xde   : > { %v274_v16 = vpop.f32.mrf.mxu0 }
  0xdf   : > { %v390_v17 = vpack.c.bf16 %v277_v15, %v276_v14 }
  0xe1   : > { %286 = vst [vmem:[%s208_s26] sm:$0xff] %v390_v17 }
  0xe2 PF: > { %s13_s14 = sadd.s32 1, %s440_s14   ;;  %s506_s12 = smov %s436_s13 }
  0xe3   : > { %p10_p5 = scmp.ge.s32.totalorder %s13_s14, 4   ;;  %s507_s13 = smov %s509_s15 }
  0xe5   :  { %12 = sbr.rel (!%p10_p5) target bundleno = 2 (0x2), region = 62 }

</bundles_post_ra>
